<compile_context>
chip_gen: v7x
topology: tpu7x:2x2x1
jax: 0.10.0
libtpu: 0.0.40
codegen_flags: <defaults>
</compile_context>

<pallas_src>
import functools

import jax
import jax.numpy as jnp
from jax.experimental import pallas as pl
from jax.experimental.pallas import tpu as pltpu

EPS = 1e-5


def _fold_bn(sum_v, sq_v, gamma, beta, inv_p):
    # Tiny [C,1] XLA op between pallas_calls: fold train-mode BN into a
    # per-channel scale/shift from single-pass sum / sum-of-squares.
    mean = sum_v * inv_p
    var = jnp.maximum(sq_v * inv_p - mean * mean, 0.0)   # guard cancellation
    scale = gamma * jax.lax.rsqrt(var + EPS)
    shift = beta - mean * scale
    return scale, shift


def _stage_kernel(*refs, prenorm, needs_mask, hw_valid, matmul_dtype):
    """One conv1x1 stage.

    Optionally BN-normalizes (precomputed scale/shift) + ReLUs the previous
    activation tile, multiplies by the stage weight on the MXU, writes the
    pre-BN output tile (possibly bf16) and accumulates this batch-block's
    per-channel sum / sum-of-squares in f32.
    """
    if prenorm:
        h_ref, sc_ref, sh_ref, w_ref, o_ref, sum_ref, sq_ref = refs
        a = h_ref[...].astype(jnp.float32) * sc_ref[...] + sh_ref[...]
        a = jnp.maximum(a, 0.0)
        if needs_mask:
            # Zero the padded pixel lanes so they contribute nothing to the
            # next conv output / stats (BN shift would otherwise leak in).
            t = a.shape[-1]
            gidx = pl.program_id(1) * t + jax.lax.broadcasted_iota(
                jnp.int32, a.shape, 1)
            a = jnp.where(gidx < hw_valid, a, 0.0)
    else:
        x_ref, w_ref, o_ref, sum_ref, sq_ref = refs
        a = x_ref[...]          # zero-padded input; conv is bias-free -> exact

    # conv1x1 == [Cout, Cin] @ [Cin, T]; conv bias omitted (cancelled by BN).
    h = jnp.dot(w_ref[...], a.astype(matmul_dtype),
                preferred_element_type=jnp.float32)          # [Cout, T] f32
    o_ref[...] = h.astype(o_ref.dtype)                       # bf16/f32 store

    @pl.when(pl.program_id(1) == 0)
    def _():
        sum_ref[...] = jnp.zeros_like(sum_ref)
        sq_ref[...] = jnp.zeros_like(sq_ref)

    # Per-batch-block partial stats (resident across the pixel axis only), so
    # the batch grid axis can be "parallel" (v7x megacore-safe).
    sum_ref[...] += jnp.sum(h, axis=1, keepdims=True)
    sq_ref[...] += jnp.sum(h * h, axis=1, keepdims=True)


def _final_kernel(*refs, skip):
    """bn3 normalize (+ residual, specialized at trace time) + final ReLU."""
    if skip:
        h_ref, sc_ref, sh_ref, x_ref, o_ref = refs
    else:
        h_ref, sc_ref, sh_ref, o_ref = refs
    y = h_ref[...].astype(jnp.float32) * sc_ref[...] + sh_ref[...]
    if skip:
        y = y + x_ref[...].astype(jnp.float32)
    o_ref[...] = jnp.maximum(y, 0.0)


def res_layer_pallas(x_nchw, params, skip, *, compute_dtype=jnp.bfloat16):
    N, Cin, H, W = x_nchw.shape
    HW = H * W
    C1 = params["w1"].shape[0]
    C2 = params["w2"].shape[0]
    C3 = params["w3"].shape[0]
    if skip:
        assert Cin == C3, "residual skip requires inplanes == planes*expansion"

    # NCHW -> [N, C, H*W] (pure reshape), pixel axis padded to a 128 multiple
    # so every tile is lane-dense and no full-HW fallback tile is ever needed.
    HW_pad = max(128, ((HW + 127) // 128) * 128)
    needs_mask = HW_pad != HW
    x3 = x_nchw.reshape(N, Cin, HW).astype(jnp.float32)
    if needs_mask:
        x3 = jnp.pad(x3, ((0, 0), (0, 0), (0, HW_pad - HW)))

    try:
        vmem_phys = pltpu.get_tpu_info().vmem_capacity_bytes
    except Exception:
        vmem_phys = 64 << 20            # conservative fallback (v7x-sized)
    vmem_limit = int(min(vmem_phys * 3 // 4, 100 << 20))

    inv_p = 1.0 / float(N * HW)         # padded pixels contribute exact zeros

    # Pre-cast weights once (halves weight bytes on the bf16 path).
    w1 = params["w1"].astype(compute_dtype)
    w2 = params["w2"].astype(compute_dtype)
    w3 = params["w3"].astype(compute_dtype)

    def pick_tile(max_ch):
        # ~8 MiB f32 tiles on 128-MiB-VMEM parts (v5e/v6e), ~2 MiB on v7x.
        budget = (8 << 20) if vmem_phys >= (96 << 20) else (2 << 20)
        t_max = max(128, (budget // (4 * max_ch)) // 128 * 128)
        t = min(t_max, HW_pad)
        while t > 128 and HW_pad % t != 0:
            t -= 128
        return t

    def act_spec(c, t):     # tiled activations, batch dim squeezed
        return pl.BlockSpec((None, c, t), lambda n, i: (n, 0, i))

    def vec_spec(c):        # per-channel [C, 1] vectors, resident
        return pl.BlockSpec((c, 1), lambda n, i: (0, 0))

    def pvec_spec(c):       # per-batch partial stats, resident over pixel axis
        return pl.BlockSpec((None, c, 1), lambda n, i: (n, 0, 0))

    def w_spec(co, ci):     # full weight, resident
        return pl.BlockSpec((co, ci), lambda n, i: (0, 0))

    def run_stage(h_in, c_in, w, c_out, scale=None, shift=None):
        prenorm = scale is not None
        t = pick_tile(max(c_in, c_out))          # per-stage tile size
        grid = (N, HW_pad // t)
        kern = functools.partial(_stage_kernel, prenorm=prenorm,
                                 needs_mask=needs_mask, hw_valid=HW,
                                 matmul_dtype=compute_dtype)
        out_shape = (jax.ShapeDtypeStruct((N, c_out, HW_pad), compute_dtype),
                     jax.ShapeDtypeStruct((N, c_out, 1), jnp.float32),
                     jax.ShapeDtypeStruct((N, c_out, 1), jnp.float32))
        out_specs = (act_spec(c_out, t), pvec_spec(c_out), pvec_spec(c_out))
        if prenorm:
            in_specs = [act_spec(c_in, t), vec_spec(c_in), vec_spec(c_in),
                        w_spec(c_out, c_in)]
            args = (h_in, scale, shift, w)
        else:
            in_specs = [act_spec(c_in, t), w_spec(c_out, c_in)]
            args = (h_in, w)
        h, ps, pq = pl.pallas_call(
            kern, grid=grid, in_specs=in_specs, out_specs=out_specs,
            out_shape=out_shape,
            compiler_params=pltpu.CompilerParams(
                dimension_semantics=("parallel", "arbitrary"),
                vmem_limit_bytes=vmem_limit))(*args)
        # Reduce the per-batch partials to global BN stats (tiny XLA op).
        return h, jnp.sum(ps, axis=0), jnp.sum(pq, axis=0)

    # stage 1: conv1 + bn1 partial stats
    h1, s1, q1 = run_stage(x3, Cin, w1, C1)
    sc1, sh1 = _fold_bn(s1, q1, params["g1"], params["be1"], inv_p)
    # stage 2: bn1 + relu + conv2 + bn2 partial stats
    h2, s2, q2 = run_stage(h1, C1, w2, C2, sc1, sh1)
    sc2, sh2 = _fold_bn(s2, q2, params["g2"], params["be2"], inv_p)
    # stage 3: bn2 + relu + conv3 + bn3 partial stats
    h3, s3, q3 = run_stage(h2, C2, w3, C3, sc2, sh2)
    sc3, sh3 = _fold_bn(s3, q3, params["g3"], params["be3"], inv_p)

    # finalize: bn3 (+ residual) + relu
    t = pick_tile(max(C3, Cin) if skip else C3)
    grid = (N, HW_pad // t)
    fin = functools.partial(_final_kernel, skip=skip)
    in_specs = [act_spec(C3, t), vec_spec(C3), vec_spec(C3)]
    args = [h3, sc3, sh3]
    if skip:
        in_specs.append(act_spec(Cin, t))
        args.append(x3)
    out = pl.pallas_call(
        fin, grid=grid, in_specs=in_specs,
        out_specs=act_spec(C3, t),
        out_shape=jax.ShapeDtypeStruct((N, C3, HW_pad), jnp.float32),
        compiler_params=pltpu.CompilerParams(
            dimension_semantics=("parallel", "parallel"),
            vmem_limit_bytes=vmem_limit))(*args)

    if needs_mask:
        out = out[:, :, :HW]
    return out.reshape(N, C3, H, W)


def init_params(key, inplanes, planes, expansion=4, std=0.01):
    # conv1x1: weight ~ N(0, std) in PyTorch [Cout, Cin] layout (1x1 squeezed),
    # bias omitted (zero-init AND cancelled by train-mode BN).
    # BatchNorm2d: weight ~ U(0,1) (pytorch_ge12 branch), bias = 0.
    out3 = planes * expansion
    ks = jax.random.split(key, 6)
    col = lambda v: v.reshape(-1, 1)
    return {
        "w1": jax.random.normal(ks[0], (planes, inplanes), jnp.float32) * std,
        "g1": col(jax.random.uniform(ks[1], (planes,), jnp.float32)),
        "be1": col(jnp.zeros((planes,), jnp.float32)),
        "w2": jax.random.normal(ks[2], (planes, planes), jnp.float32) * std,
        "g2": col(jax.random.uniform(ks[3], (planes,), jnp.float32)),
        "be2": col(jnp.zeros((planes,), jnp.float32)),
        "w3": jax.random.normal(ks[4], (out3, planes), jnp.float32) * std,
        "g3": col(jax.random.uniform(ks[5], (out3,), jnp.float32)),
        "be3": col(jnp.zeros((out3,), jnp.float32)),
    }


def res_layer_ref(x_nchw, params, skip):
    # Pure-JAX reference (PyTorch forward semantics, train-mode BN).
    N, Cin, H, W = x_nchw.shape
    x = x_nchw.reshape(N, Cin, H * W).astype(jnp.float32)

    def conv_bn(h, w, g, b, relu):
        y = jnp.einsum("oc,nct->not", w, h,
                       precision=jax.lax.Precision.HIGHEST)
        m = jnp.mean(y, axis=(0, 2), keepdims=True)
        v = jnp.mean((y - m) ** 2, axis=(0, 2), keepdims=True)
        y = (y - m) * jax.lax.rsqrt(v + EPS) * g.reshape(1, -1, 1) \
            + b.reshape(1, -1, 1)
        return jnp.maximum(y, 0.0) if relu else y

    h = conv_bn(x, params["w1"], params["g1"], params["be1"], True)
    h = conv_bn(h, params["w2"], params["g2"], params["be2"], True)
    h = conv_bn(h, params["w3"], params["g3"], params["be3"], False)
    if skip:
        h = h + x
    h = jnp.maximum(h, 0.0)
    return h.reshape(N, -1, H, W)


if __name__ == "__main__":
    key = jax.random.PRNGKey(0)
    k_x, k_p, k_x2, k_p2 = jax.random.split(key, 4)

    # Config A: ResLayer(inplanes=16, planes=4, expansion=4) -> skip=True.
    # HW = 64 < 128 exercises the pad-to-128 + lane-mask path.
    N, Cin, H, W = 2, 16, 8, 8
    planes, expansion = 4, 4
    x = jax.random.normal(k_x, (N, Cin, H, W), jnp.float32)
    params = init_params(k_p, Cin, planes, expansion)
    skip = (Cin == planes * expansion)

    ref = res_layer_ref(x, params, skip)

    # Full-f32 path (tight tolerance).
    out = jax.block_until_ready(
        res_layer_pallas(x, params, skip, compute_dtype=jnp.float32))
    assert out.shape == (N, planes * expansion, H, W)
    assert jnp.allclose(out, ref, atol=1e-3, rtol=1e-3), \
        float(jnp.max(jnp.abs(out - ref)))

    # Default bf16 path: bf16 matmul operands + bf16 inter-stage activations,
    # BN stats/normalize in f32 -> loose tolerance.
    out_bf16 = jax.block_until_ready(res_layer_pallas(x, params, skip))
    assert jnp.allclose(out_bf16, ref, atol=1e-1, rtol=1e-1), \
        float(jnp.max(jnp.abs(out_bf16 - ref)))

    # Config B: inplanes != planes*expansion -> skip specialized away; HW=256
    # is already a multiple of 128 -> no padding / no lane mask.
    Nb, Cb, Hb, Wb = 2, 8, 16, 16
    xb = jax.random.normal(k_x2, (Nb, Cb, Hb, Wb), jnp.float32)
    pb = init_params(k_p2, Cb, planes=4, expansion=4)
    out_b = jax.block_until_ready(
        res_layer_pallas(xb, pb, skip=False, compute_dtype=jnp.float32))
    ref_b = res_layer_ref(xb, pb, False)
    assert out_b.shape == (Nb, 16, Hb, Wb)
    assert jnp.allclose(out_b, ref_b, atol=1e-3, rtol=1e-3), \
        float(jnp.max(jnp.abs(out_b - ref_b)))

    # TODO(synk): PyTorch's train-mode BN also updates running_mean/var buffers
    # as a side effect; that bookkeeping is not part of the forward output and
    # is not replicated here.
    print("KERNEL_OK")
</pallas_src>

<mosaic_0001>
module attributes {stable_mosaic.version = 11 : i64} {
  func.func @_stage_kernel(%arg0: i32, %arg1: i32, %arg2: memref<1x16x128xf32, #tpu.memory_space<vmem>>, %arg3: memref<4x16xf32, #tpu.memory_space<vmem>>, %arg4: memref<1x4x128xf32, #tpu.memory_space<vmem>>, %arg5: memref<1x4x1xf32, #tpu.memory_space<vmem>>, %arg6: memref<1x4x1xf32, #tpu.memory_space<vmem>>) attributes {dimension_semantics = [#tpu.dimension_semantics<parallel>, #tpu.dimension_semantics<arbitrary>], iteration_bounds = array<i64: 2, 1>, scalar_prefetch = 0 : i64, scratch_operands = 0 : i64, tpu.core_type = #tpu.core_type<tc>, window_params = [{transform_indices = @transform_0, window_bounds = array<i64: 1, 16, 128>}, {pipeline_mode = #tpu.pipeline_mode<synchronous>, transform_indices = @transform_1, window_bounds = array<i64: 4, 16>}, {transform_indices = @transform_2, window_bounds = array<i64: 1, 4, 128>}, {transform_indices = @transform_3, window_bounds = array<i64: 1, 4, 1>}, {transform_indices = @transform_4, window_bounds = array<i64: 1, 4, 1>}]} {
    %c0 = arith.constant 0 : index
    %c0_0 = arith.constant 0 : index
    %c0_1 = arith.constant 0 : index
    %0 = vector.load %arg2[%c0, %c0_0, %c0_1] : memref<1x16x128xf32, #tpu.memory_space<vmem>>, vector<1x16x128xf32>
    %1 = vector.shape_cast %0 : vector<1x16x128xf32> to vector<16x128xf32>
    %c0_2 = arith.constant 0 : index
    %c0_3 = arith.constant 0 : index
    %2 = vector.load %arg3[%c0_2, %c0_3] : memref<4x16xf32, #tpu.memory_space<vmem>>, vector<4x16xf32>
    %cst = arith.constant dense<0.000000e+00> : vector<4x128xf32>
    %3 = tpu.matmul %2, %1, %cst {dimension_numbers = #tpu.dot_dimension_numbers<[1], [0], [0], [1], [0, 0, 1, 1], [], []>} : vector<4x16xf32>, vector<16x128xf32>, vector<4x128xf32> -> vector<4x128xf32>
    %c0_4 = arith.constant 0 : index
    %c0_5 = arith.constant 0 : index
    %c0_6 = arith.constant 0 : index
    %4 = vector.load %arg4[%c0_4, %c0_5, %c0_6] : memref<1x4x128xf32, #tpu.memory_space<vmem>>, vector<1x4x128xf32>
    %5 = vector.shape_cast %4 : vector<1x4x128xf32> to vector<4x128xf32>
    %6 = vector.shape_cast %3 : vector<4x128xf32> to vector<1x4x128xf32>
    tpu.vector_store %arg4[%c0_4, %c0_5, %c0_6], %6 {strides = array<i32>} : memref<1x4x128xf32, #tpu.memory_space<vmem>>, vector<1x4x128xf32>,
    %c0_i32 = arith.constant 0 : i32
    %7 = arith.cmpi eq, %arg1, %c0_i32 : i32
    %8 = arith.extui %7 : i1 to i32
    %c0_i32_7 = arith.constant 0 : i32
    %9 = arith.cmpi ne, %8, %c0_i32_7 : i32
    scf.if %9 {
      %cst_22 = arith.constant 0.000000e+00 : f32
      %27 = vector.broadcast %cst_22 : f32 to vector<4x1xf32>
      %c0_23 = arith.constant 0 : index
      %c0_24 = arith.constant 0 : index
      %c0_25 = arith.constant 0 : index
      %28 = vector.load %arg5[%c0_23, %c0_24, %c0_25] : memref<1x4x1xf32, #tpu.memory_space<vmem>>, vector<1x4x1xf32>
      %29 = vector.shape_cast %28 : vector<1x4x1xf32> to vector<4x1xf32>
      %30 = vector.shape_cast %27 : vector<4x1xf32> to vector<1x4x1xf32>
      tpu.vector_store %arg5[%c0_23, %c0_24, %c0_25], %30 {strides = array<i32>} : memref<1x4x1xf32, #tpu.memory_space<vmem>>, vector<1x4x1xf32>,
      %cst_26 = arith.constant 0.000000e+00 : f32
      %31 = vector.broadcast %cst_26 : f32 to vector<4x1xf32>
      %c0_27 = arith.constant 0 : index
      %c0_28 = arith.constant 0 : index
      %c0_29 = arith.constant 0 : index
      %32 = vector.load %arg6[%c0_27, %c0_28, %c0_29] : memref<1x4x1xf32, #tpu.memory_space<vmem>>, vector<1x4x1xf32>
      %33 = vector.shape_cast %32 : vector<1x4x1xf32> to vector<4x1xf32>
      %34 = vector.shape_cast %31 : vector<4x1xf32> to vector<1x4x1xf32>
      tpu.vector_store %arg6[%c0_27, %c0_28, %c0_29], %34 {strides = array<i32>} : memref<1x4x1xf32, #tpu.memory_space<vmem>>, vector<1x4x1xf32>,
    } else {
    }
    %c0_8 = arith.constant 0 : index
    %c0_9 = arith.constant 0 : index
    %c0_10 = arith.constant 0 : index
    %10 = vector.load %arg5[%c0_8, %c0_9, %c0_10] : memref<1x4x1xf32, #tpu.memory_space<vmem>>, vector<1x4x1xf32>
    %11 = vector.shape_cast %10 : vector<1x4x1xf32> to vector<4x1xf32>
    %cst_11 = arith.constant dense<0.000000e+00> : vector<4xf32>
    %12 = vector.multi_reduction <add>, %3, %cst_11 [1] : vector<4x128xf32> to vector<4xf32>
    %13 = vector.shape_cast %12 : vector<4xf32> to vector<4x1xf32>
    %14 = arith.addf %11, %13 : vector<4x1xf32>
    %c0_12 = arith.constant 0 : index
    %c0_13 = arith.constant 0 : index
    %c0_14 = arith.constant 0 : index
    %15 = vector.load %arg5[%c0_12, %c0_13, %c0_14] : memref<1x4x1xf32, #tpu.memory_space<vmem>>, vector<1x4x1xf32>
    %16 = vector.shape_cast %15 : vector<1x4x1xf32> to vector<4x1xf32>
    %17 = vector.shape_cast %14 : vector<4x1xf32> to vector<1x4x1xf32>
    tpu.vector_store %arg5[%c0_12, %c0_13, %c0_14], %17 {strides = array<i32>} : memref<1x4x1xf32, #tpu.memory_space<vmem>>, vector<1x4x1xf32>,
    %c0_15 = arith.constant 0 : index
    %c0_16 = arith.constant 0 : index
    %c0_17 = arith.constant 0 : index
    %18 = vector.load %arg6[%c0_15, %c0_16, %c0_17] : memref<1x4x1xf32, #tpu.memory_space<vmem>>, vector<1x4x1xf32>
    %19 = vector.shape_cast %18 : vector<1x4x1xf32> to vector<4x1xf32>
    %20 = arith.mulf %3, %3 : vector<4x128xf32>
    %cst_18 = arith.constant dense<0.000000e+00> : vector<4xf32>
    %21 = vector.multi_reduction <add>, %20, %cst_18 [1] : vector<4x128xf32> to vector<4xf32>
    %22 = vector.shape_cast %21 : vector<4xf32> to vector<4x1xf32>
    %23 = arith.addf %19, %22 : vector<4x1xf32>
    %c0_19 = arith.constant 0 : index
    %c0_20 = arith.constant 0 : index
    %c0_21 = arith.constant 0 : index
    %24 = vector.load %arg6[%c0_19, %c0_20, %c0_21] : memref<1x4x1xf32, #tpu.memory_space<vmem>>, vector<1x4x1xf32>
    %25 = vector.shape_cast %24 : vector<1x4x1xf32> to vector<4x1xf32>
    %26 = vector.shape_cast %23 : vector<4x1xf32> to vector<1x4x1xf32>
    tpu.vector_store %arg6[%c0_19, %c0_20, %c0_21], %26 {strides = array<i32>} : memref<1x4x1xf32, #tpu.memory_space<vmem>>, vector<1x4x1xf32>,
    return
  }
  func.func @transform_0(%arg0: i32, %arg1: i32) -> (i32, i32, i32) {
    %c0_i32 = arith.constant 0 : i32
    %c0_i32_0 = arith.constant 0 : i32
    return %arg0, %c0_i32, %arg1 : i32, i32, i32
  }
  func.func @transform_1(%arg0: i32, %arg1: i32) -> (i32, i32) {
    %c0_i32 = arith.constant 0 : i32
    %c0_i32_0 = arith.constant 0 : i32
    %c0_i32_1 = arith.constant 0 : i32
    return %c0_i32, %c0_i32_0 : i32, i32
  }
  func.func @transform_2(%arg0: i32, %arg1: i32) -> (i32, i32, i32) {
    %c0_i32 = arith.constant 0 : i32
    %c0_i32_0 = arith.constant 0 : i32
    return %arg0, %c0_i32, %arg1 : i32, i32, i32
  }
  func.func @transform_3(%arg0: i32, %arg1: i32) -> (i32, i32, i32) {
    %c0_i32 = arith.constant 0 : i32
    %c0_i32_0 = arith.constant 0 : i32
    %c0_i32_1 = arith.constant 0 : i32
    return %arg0, %c0_i32, %c0_i32_0 : i32, i32, i32
  }
  func.func @transform_4(%arg0: i32, %arg1: i32) -> (i32, i32, i32) {
    %c0_i32 = arith.constant 0 : i32
    %c0_i32_0 = arith.constant 0 : i32
    %c0_i32_1 = arith.constant 0 : i32
    return %arg0, %c0_i32, %c0_i32_0 : i32, i32, i32
  }
}

</mosaic_0001>

<bundles_post_ra>
// kernel: tpu_custom_call.1
= control target key start
LH: loop header
LB: loop body
LE: loop exit
PB: predicated region body
PF: predicated region fallthrough
CT: control target
= control target key end

     0   :  { %10 = vsyncpa [#allocation3], 0  ;;  %s1061_s0 = inlined_call_operand.hbm [shape: f32[2,16,128], index: 0, kind: input, shape index: {}]   ;;  %s1062_s1 = inlined_call_operand.hbm [shape: f32[4,16], index: 1, kind: input, shape index: {}]   ;;  %s1063_s2 = inlined_call_operand.hbm [shape: f32[2,4,128], index: 2, kind: output, shape index: {0}]   ;;  %s1064_s3 = inlined_call_operand.vmem [shape: f32[2,4,1], index: 3, kind: output, shape index: {1}]   ;;  %s1065_s4 = inlined_call_operand.vmem [shape: f32[2,4,1], index: 4, kind: output, shape index: {2}]  }
   0x1   :  { %12 = vsyncpa [#allocation3 + $0x1], 0 }
   0x2   :  { %13 = vsyncpa [#allocation6], 0 }
   0x3   :  { %14 = vsyncpa [#allocation4], 0 }
   0x4   :  { %16 = vsyncpa [#allocation4 + $0x1], 0  ;;  %s825_s15 = smov 0   ;;  %s827_s16 = smov 0  }
   0x5   :  { %s829_s17 = smov 0   ;;  %s831_s18 = smov 0  }
   0x6   :  { %s833_s19 = smov 0   ;;  %s835_s20 = smov 0  }
   0x7 LB: > { %s535_s21 = sadd.s32 4294967295, %s790_s20   ;;  %s536_s22 = sadd.s32 4294967294, %s790_s20   ;;  %s790_s20 = sphi %s835_s20, %s22_s20   ;;  %s786_s19 = sphi %s833_s19, %s1093_s19   ;;  %s782_s18 = sphi %s831_s18, %s1092_s18   ;;  %s778_s17 = sphi %s829_s17, %s1091_s17   ;;  %s774_s16 = sphi %s827_s16, %s1090_s16   ;;  %s770_s15 = sphi %s825_s15, %s1089_s15  }
   0x8   : > { %s43_s23 = sadd.s32 1, %s778_s17  ;;  %p50_p0 = scmp.ne.s32.totalorder %s778_s17, %s774_s16 }
   0x9   : > { %p51_p1 = scmp.eq.s32.totalorder %s790_s20, 0  ;;  %p56_p2 = scmp.ne.s32.totalorder %s774_s16, %s770_s15 }
   0xa   : > { %p863_p3 = scmp.eq.s32.totalorder %s535_s21, 0  ;;  %p103_p4 = scmp.eq.s32.totalorder %s535_s21, 1 }
   0xb   : > { %p867_p5 = por %p51_p1, %p50_p0  ;;  %p109_p6 = scmp.eq.s32.totalorder %s536_s22, 1 }
   0xc   : > { %s1072_s24 = scalar_select %p863_p3, 1, 0 }
   0xd   : > { %p873_p7 = por %p863_p3, %p56_p2  ;;  %p877_p8 = por %p103_p4, %p50_p0 }
   0xe   : > { %p881_p9 = por %p109_p6, %p56_p2  ;;  %p537_p10 = scmp.ge.s32.totalorder %s790_s20, 1 }
   0xf   : > { %s1074_s26 = scalar_select %p873_p7, 1, 0 }
  0x10   : > { %s1075_s27 = scalar_select %p877_p8, 1, 0 }
  0x11   : > { %s1076_s28 = scalar_select %p881_p9, 1, 0 }
  0x12   : > { %p168_p11 = scmp.lt.s32.totalorder %s790_s20, 3  ;;  %s792_s30 = smov [#allocation5]  }
  0x13   : > { %s181_s5 = sshll.u32 %s792_s30, 4  ;;  %p589_p1 = scmp.lt.s32.totalorder %s790_s20, 2  ;;  %s182_s5 = int_to_ptr.vmem [resolvable:$true] %s181_s5 }
  0x14   : > { %p888_p13 = pnand %p537_p10, %p168_p11  ;;  %s34_s8 = sadd.s32 1, %s786_s19 }
  0x15   : > { %p897_p4 = pnand %p589_p1, %p867_p5  ;;  %p908_p6 = scmp.ge.s32.totalorder %s34_s8, 2 }
  0x16   : > { %s1077_s29 = scalar_select %p888_p13, 1, 0 }
  0x17   : > { %p576_p0 = pneg %p888_p13  ;;  %s192_s10 = sand.u32 1, %s778_s17  }
  0x18   : > { %s1078_s6 = scalar_select %p897_p4, 1, 0 }
  0x19   : > { %p903_p2 = pnand %p576_p0, %p863_p3  ;;  %s646_s13 = scalar_lea.hbm %s1062_s1, 64 }
  0x1a   : > { %s1080_s9 = scalar_select %p908_p6, 1, 0 }
  0x1b   : > { %p647_p5 = scmp.ne.s32.totalorder %s1062_s1, %s646_s13  ;;  %p648_p10 = pneg %p903_p2 }
  0x1c   : > { %p653_p0 = scmp.lt.u32.totalorder %s646_s13, %s1062_s1 }
  0x1d   : > { %p649_p11 = pnand %p648_p10, %p647_p5 }
  0x1f   : > { %p650_p1 = pneg %p649_p11 }
  0x21   : > { %p655_p12 = pnand %p653_p0, %p650_p1 }
  0x23   : > { %658 = shalt.err (!%p655_p12)
}
  0x24   : > { %s659_s30 = scalar_lea.vmem %s182_s5, 64  ;;  %p667_p7 = scmp.lt.s32.totalorder %s182_s5, %s182_s5 }
  0x25   : > { %p660_p9 = scmp.ne.s32.totalorder %s182_s5, %s659_s30  ;;  %p668_p13 = scmp.lt.s32.totalorder %s659_s30, %s659_s30 }
  0x27   : > { %p662_p8 = pnand %p660_p9, %p648_p10  ;;  %p669_p4 = por %p668_p13, %p667_p7 }
  0x29   : > { %p663_p3 = pneg %p662_p8 }
  0x2b   : > { %p670_p6 = pnand %p669_p4, %p663_p3 }
  0x2d   : > { %673 = shalt.err (!%p670_p6)
}
  0x2e   : > { %579 = dma.hbm_to_vmem [thread:$0]  (!%p903_p2), %s1062_s1, 64, %s182_s5, [#allocation6]  }
  0x2f   : > { %p1081_p9 = scmp.ne.s32.totalorder %s1080_s9, 0  ;;  %s540_s13 = sshll.u32 %s192_s10, 4 }
  0x30   : > { %s554_s21 = sshll.u32 %s786_s19, 8  ;;  %s196_s30 = scalar_lea.vmem [#allocation2], %s540_s13 }
  0x31   : > { %s1095_s8 = smov (%p1081_p9, %s34_s8), 0  ;;  %s939_s25 = scalar_lea.hbm %s1061_s0, %s554_s21 }
  0x32   : > { %s38_s14 = ssub.s32 %s786_s19, %s1095_s8  ;;  %s204_s11 = sshll.u32 %s196_s30, 4  ;;  %s946_s11 = int_to_ptr.vmem [resolvable:$true] %s204_s11 }
  0x33   : > { %p41_p3 = scmp.eq.s32.totalorder %s38_s14, 0  ;;  %s948_s9 = scalar_lea.sflag [#allocation3], %s192_s10 }
  0x34   : > { %s674_s12 = scalar_lea.hbm %s939_s25, 256  ;;  %p1082_p8 = scmp.ne.s32.totalorder %s1078_s6, 0 }
  0x35   : > { %s944_s5 = scalar_select %p41_p3, %s778_s17, %s43_s23  }
  0x36   : > { %p675_p7 = scmp.ne.s32.totalorder %s939_s25, %s674_s12  ;;  %p676_p12 = pneg %p1082_p8 }
  0x37   : > { %s679_s13 = scalar_lea.hbm %s1061_s0, 512  ;;  %p680_p2 = scmp.lt.u32.totalorder %s939_s25, %s1061_s0 }
  0x38   : > { %p677_p13 = pnand %p676_p12, %p675_p7  ;;  %p681_p6 = scmp.lt.u32.totalorder %s679_s13, %s674_s12 }
  0x39   : > { %p683_p10 = scmp.lt.u32.totalorder %s674_s12, %s939_s25 }
  0x3a   : > { %p678_p4 = pneg %p677_p13  ;;  %p682_p5 = por %p681_p6, %p680_p2 }
  0x3c   : > { %p684_p11 = por %p683_p10, %p682_p5 }
  0x3e   : > { %p685_p1 = pnand %p684_p11, %p678_p4 }
  0x40   : > { %688 = shalt.err (!%p685_p1)
}
  0x41   : > { %s689_s23 = scalar_lea.vmem %s946_s11, 256  ;;  %s793_s10 = smov [#allocation2]  }
  0x42   : > { %p690_p0 = scmp.ne.s32.totalorder %s946_s11, %s689_s23  ;;  %s694_s30 = sshll.u32 %s793_s10, 4  ;;  %s695_s30 = int_to_ptr.vmem [resolvable:$false] %s694_s30 }
  0x43   : > { %s696_s14 = scalar_lea.vmem %s695_s30, 512  ;;  %p697_p7 = scmp.lt.s32.totalorder %s946_s11, %s695_s30 }
  0x44   : > { %p692_p9 = pnand %p690_p0, %p676_p12  ;;  %p698_p13 = scmp.lt.s32.totalorder %s696_s14, %s689_s23 }
  0x46   : > { %p693_p3 = pneg %p692_p9  ;;  %p699_p2 = por %p698_p13, %p697_p7 }
  0x48   : > { %p700_p6 = pnand %p699_p2, %p693_p3 }
  0x4a   : > { %703 = shalt.err (!%p700_p6)
}
  0x4b   : > { %s794_s12 = smov 128   ;;  %s795_s21 = smov 8  }
  0x4c   : > { %583 = dma.hbm_to_vmem [thread:$0]  (!%p1082_p8), %s939_s25, 256, %s946_s11, %s948_s9, %s794_s12, %s794_s12, %s795_s21  }
  0x4d   : > { %p1083_p12 = scmp.ne.s32.totalorder %s1077_s29, 0 }
  0x4e   : > { %s979_s13 = sand.u32 (!%p1083_p12), 1, %s774_s16   ;;  %p1084_p4 = scmp.ne.s32.totalorder (!%p1083_p12), %s1074_s26, 0 }
  0x4f   : > { %216 = sbr.rel (%p1083_p12) target bundleno = 459 (0x1cb), region = 28  ;;  %s544_s7 = sshll.u32 (!%p1083_p12), %s979_s13, 4 }
  0x50   : > { %s219_s22 = scalar_lea.sflag (!%p1083_p12), [#allocation3], %s979_s13  ;;  %s222_s23 = scalar_lea.vmem (!%p1083_p12), [#allocation2], %s544_s7 }
  0x56   : > { %757 = dma.done.wait (%p1084_p4), %s219_s22, 256  }
  0x57   : > { %759 = vsyncadd (%p1084_p4), %s219_s22, 4294967040  ;;  %p1085_p5 = scmp.ne.s32.totalorder %s1072_s24, 0 }
  0x59   : > { %761 = dma.done.wait (%p1085_p5), [#allocation6], 64  }
  0x5a   : > { %763 = vsyncadd (%p1085_p5), [#allocation6], 4294967232  ;;  %v796_v0 = vmov 0.0|0.0   ;;  %vm797_vm0 = vmmov 0   ;;  %v798_v1 = vmov 0.0   ;;  %v267_v2 = vld [vmem:[%s222_s23] sm:$0xff] }
  0x5b   : > { %565 = vmatprep.subr.bf16.mxu0 %v796_v0  ;;  %562 = vmatprep.mubr.msk.f32.mxu0 %vm797_vm0, %v798_v1  ;;  %v268_v3 = vld [vmem:[%s222_s23 + $0x8] sm:$0xff]  ;;  %v269_v5 = vld [vmem:[#allocation5] sm:$0xf]  ;;  %vm270_vm1 = vcmask 130048   ;;  %p259_p8 = scmp.lt.s32.totalorder %s782_s18, 1  ;;  %vm349_vm2 = vcmask 3072  }
  0x5c   : > { %v566_v4 = vpack.c.bf16 %v268_v3, %v267_v2  ;;  %s546_s11 = sshll.u32 %s979_s13, 2  ;;  %vm353_vm3 = vcmask 1043456   ;;  %s551_s12 = sshll.u32 %s782_s18, 6 }
  0x5d   : > { %s260_s26 = scalar_select %p259_p8, %s782_s18, 1 }
  0x5e   : > { %567 = vmatpush3.bf16.msra.mxu0 %v566_v4  ;;  %s246_s9 = scalar_lea.vmem [#allocation7], %s546_s11  ;;  %s1012_s23 = scalar_lea.hbm %s1063_s2, %s551_s12 }
  0x5f   : > { %s547_s24 = sshll.u32 %s260_s26, 2  ;;  %s390_s21 = sshll.u32 %s246_s9, 4  ;;  %s391_s21 = int_to_ptr.vmem [resolvable:$true] %s390_s21 }
  0x60   : > { %s996_s25 = scalar_lea.vmem %s1064_s3, %s547_s24  ;;  %s1004_s14 = scalar_lea.vmem %s1065_s4, %s547_s24 }
  0x61   : > { %563 = vmatmul.mubr.msk.f32.vlgmr.msra.gmra.mrb[0].mxu0 %vm270_vm1, %v269_v5  ;;  %350 = vst.msk [vmem:[%s996_s25] sm:$0xf] %vm349_vm2, %v798_v1  ;;  %351 = vst.msk [vmem:[%s1004_s14] sm:$0xf] %vm349_vm2, %v798_v1  ;;  %s368_s26 = scalar_lea.sflag [#allocation4], %s979_s13  ;;  %s704_s29 = scalar_lea.vmem %s391_s21, 64 }
  0x62   : > { %p705_p10 = scmp.ne.s32.totalorder %s391_s21, %s704_s29  ;;  %p1086_p11 = scmp.ne.s32.totalorder %s1075_s27, 0 }
  0x63   : > { %s799_s6 = smov [#allocation7]  }
  0x64   : > { %p706_p1 = pnand %p705_p10, %p1086_p11  ;;  %s708_s24 = sshll.u32 %s799_s6, 4  ;;  %s709_s24 = int_to_ptr.vmem [resolvable:$false] %s708_s24 }
  0x65   : > { %s710_s11 = scalar_lea.vmem %s709_s24, 128  ;;  %p711_p9 = scmp.lt.s32.totalorder %s391_s21, %s709_s24 }
  0x66   : > { %p707_p0 = pneg %p706_p1  ;;  %p712_p3 = scmp.lt.s32.totalorder %s710_s11, %s704_s29 }
  0x68   : > { %p713_p7 = por %p712_p3, %p711_p9 }
  0x6a   : > { %p714_p13 = pnand %p713_p7, %p707_p0 }
 0x134   : > { %v340_v6 = vpop.f32.mrb[0].mxu0 }
 0x135   : > { %344 = vst [vmem:[%s246_s9] sm:$0xf] %v340_v6  ;;  %v564_v7 = vpop.f32.mrb[1].mxu0  ;;  %v354_v8 = vsel %vm353_vm3, %v340_v6, 0.0  ;;  %v361_v9 = vmul.f32 %v340_v6, %v340_v6 }
 0x136   : > { %355 = vadd.xlane.f32.xlu0 %v354_v8 }
 0x137   : > { %v362_v10 = vsel %vm353_vm3, %v361_v9, 0.0 }
 0x13a   : > { %363 = vadd.xlane.f32.xlu0 %v362_v10 }
 0x13b   : > { %717 = shalt.err (!%p714_p13)
}
 0x13c   : > { %s718_s18 = scalar_lea.hbm %s1012_s23, 64  ;;  %s722_s10 = scalar_lea.hbm %s1063_s2, 128 }
 0x13d   : > { %p719_p2 = scmp.ne.s32.totalorder %s1012_s23, %s718_s18  ;;  %p723_p4 = scmp.lt.u32.totalorder %s1012_s23, %s1063_s2 }
 0x13e   : > { %p724_p5 = scmp.lt.u32.totalorder %s722_s10, %s718_s18  ;;  %p726_p10 = scmp.lt.u32.totalorder %s718_s18, %s1012_s23 }
 0x13f   : > { %p720_p6 = pnand %p719_p2, %p1086_p11 }
 0x140   : > { %p725_p8 = por %p724_p5, %p723_p4 }
 0x141   : > { %p721_p12 = pneg %p720_p6 }
 0x142   : > { %p727_p1 = por %p726_p10, %p725_p8 }
 0x144   : > { %p728_p0 = pnand %p727_p1, %p721_p12 }
 0x146   : > { %731 = shalt.err (!%p728_p0)
}
 0x147   : > { %574 = dma.vmem_to_hbm [thread:$0]  (%p1086_p11), %s391_s21, 64, %s1012_s23, %s368_s26   ;;  %v352_v11 = vld [vmem:[%s996_s25] sm:$0xf] }
 0x148   : > { %v360_v14 = vld [vmem:[%s1004_s14] sm:$0xf] }
 0x1c3   : > { %v356_v12 = vpop.xlane.xlu0 %355 }
 0x1c4   : > { %v357_v13 = vadd.f32 %v356_v12, %v352_v11 }
 0x1c6   : > { %359 = vst.msk [vmem:[%s996_s25] sm:$0xf] %vm349_vm2, %v357_v13 }
 0x1c7   : > { %v364_v15 = vpop.xlane.xlu0 %363 }
 0x1c8   : > { %v365_v16 = vadd.f32 %v364_v15, %v360_v14 }
 0x1ca   : > { %366 = vst.msk [vmem:[%s1004_s14] sm:$0xf] %vm349_vm2, %v365_v16 }
 0x1cb PF: > { %s408_s27 = sand.u32 1, %s770_s15   ;;  %p1087_p9 = scmp.ne.s32.totalorder %s1076_s28, 0 }
 0x1cc   : > { %p1088_p3 = scmp.ge.s32.totalorder %s790_s20, 2  ;;  %s409_s7 = scalar_lea.sflag [#allocation4], %s408_s27 }
 0x1ce   : > { %p585_p7 = pnand %p1088_p3, %p1087_p9 }
 0x1d0   : > { %765 = dma.done.wait (!%p585_p7), %s409_s7, 64  }
 0x1d1   : > { %767 = vsyncadd (!%p585_p7), %s409_s7, 4294967232  ;;  %s22_s20 = sadd.s32 1, %s790_s20   ;;  %s1089_s15 = smov %s774_s16 }
 0x1d2   : > { %p19_p11 = scmp.ge.s32.totalorder %s22_s20, 4   ;;  %s1090_s16 = smov %s778_s17 }
 0x1d3   : > { %s1091_s17 = smov %s944_s5  ;;  %s1092_s18 = smov %s786_s19 }
 0x1d4   : > { %s1093_s19 = smov %s1095_s8  ;;  %21 = sbr.rel (!%p19_p11) target bundleno = 7 (0x7), region = 105 }
 0x1db   :  { %428 = vsyncpa [#allocation3], 1 }
 0x1dc   :  { %430 = vsyncpa [#allocation3 + $0x1], 1 }
 0x1dd   :  { %431 = vsyncpa [#allocation6], 1 }
 0x1de   :  { %432 = vsyncpa [#allocation4], 1 }
 0x1df   :  { %434 = vsyncpa [#allocation4 + $0x1], 1 }

</bundles_post_ra>
